<compile_context>
chip_gen: v7x
topology: tpu7x:2x2x1
jax: 0.10.0
libtpu: 0.0.40
codegen_flags: <defaults>
</compile_context>

<pallas_src>
import functools

import jax
import jax.numpy as jnp
from jax import lax
from jax.experimental import pallas as pl
from jax.experimental.pallas import tpu as pltpu


def _subpixel_phase_taps(k, stride, padding):
    """Static tap structure of the stride-2 sub-pixel decomposition.

    Returns [((py, px), ((dy, dx, ky, kx), ...)), ...] such that
      out[:, :, 2r+py, 2c+px] = sum over taps of x[:, :, r+dy, c+dx] @ w[:, :, ky, kx]
    (out-of-range r+dy / c+dx contribute zero).
    """
    if stride != 2:
        raise NotImplementedError("only stride=2 decoder blocks are supported")
    phases = []
    for py in range(stride):
        for px in range(stride):
            taps = []
            for ky in range(k):
                if (py + padding - ky) % stride:
                    continue
                dy = (py + padding - ky) // stride
                for kx in range(k):
                    if (px + padding - kx) % stride:
                        continue
                    dx = (px + padding - kx) // stride
                    taps.append((dy, dx, ky, kx))
            phases.append(((py, px), tuple(taps)))
    for _, taps in phases:
        for dy, dx, _, _ in taps:
            if dy not in (0, 1) or dx not in (0, 1):
                raise NotImplementedError("tap offsets outside {0,1} not supported")
    return phases


def _decoder_subpixel_kernel(w_ref, b_ref, x_ref, o_ref, *,
                             phase_specs, spatial, act, batch_block):
    # w_ref : (T, C_out, C_in)          per-tap matmul weights (T = k*k)
    # b_ref : (C_out, 1)
    # x_ref : (batch_block, C_in, M)    M = H*W, lane-dense
    # o_ref : (batch_block, 4, C_out, M) phase-major, lane-dense stores
    H, W = spatial
    M = H * W
    C_in = x_ref.shape[1]
    C_out = w_ref.shape[1]

    # Destination-column index of every lane (used to zero c+dx >= W taps).
    col = lax.broadcasted_iota(jnp.int32, (C_in, M), 1) % W
    bias = b_ref[...].astype(jnp.float32)                        # (C_out, 1)

    def shifted(xf, dy, dx):
        # y[:, r*W + c] = x[:, r+dy, c+dx], zero where out of range.
        d = dy * W + dx
        y = xf
        if d:
            y = jnp.concatenate(
                [xf[:, d:], jnp.zeros((C_in, d), xf.dtype)], axis=1)
        if dx:
            y = jnp.where(col < (W - dx), y, 0.0)
        return y

    for bl in range(batch_block):                                 # static unroll
        xf = x_ref[bl].astype(jnp.float32)                        # (C_in, M)
        shifts = {}
        for _, taps in phase_specs:
            for _, dy, dx in taps:
                if (dy, dx) not in shifts:
                    shifts[(dy, dx)] = shifted(xf, dy, dx)

        for (py, px), taps in phase_specs:
            acc = jnp.zeros((C_out, M), jnp.float32)
            for tap_idx, dy, dx in taps:                          # dense K=C_in dots
                acc = acc + jnp.dot(w_ref[tap_idx], shifts[(dy, dx)],
                                    preferred_element_type=jnp.float32)
            acc = acc + bias                                      # broadcast over M
            if act == "relu":
                acc = jnp.maximum(acc, 0.0)                       # VPU
            elif act == "sigmoid":
                acc = jax.nn.sigmoid(acc)                         # EUP
            # act == "identity": nothing
            o_ref[bl, 2 * py + px] = acc.astype(o_ref.dtype)


def make_decoder_block(weight, bias, *, stride, padding, output_padding,
                       act="relu"):
    """Prepare a Decoder_block forward (ConvTranspose2d + activation).

    weight: (C_in, C_out, k, k) in PyTorch ConvTranspose2d layout; bias: (C_out,).
    Parameter reshuffling is done once here (hoisted out of the per-call path).
    Returns a jitted forward(x: (B, C_in, H, W)) -> (B, C_out, stride*H, stride*W).
    """
    C_in, C_out, k, k2 = weight.shape
    assert k == k2
    if output_padding >= stride:
        raise ValueError("PyTorch requires output_padding < stride")
    if k + output_padding - 2 * padding != stride:
        raise NotImplementedError(
            "sub-pixel path needs H_out == stride*H "
            "(k + output_padding - 2*padding == stride)")
    phases = _subpixel_phase_taps(k, stride, padding)

    # ---- hoisted parameter prep (once per parameter set) ---------------------
    tap_mats, phase_specs, t = [], [], 0
    for (py, px), taps in phases:
        entries = []
        for dy, dx, ky, kx in taps:
            tap_mats.append(weight[:, :, ky, kx].T)               # (C_out, C_in)
            entries.append((t, dy, dx))
            t += 1
        phase_specs.append(((py, px), tuple(entries)))
    phase_specs = tuple(phase_specs)
    w_taps = jnp.stack(tap_mats, axis=0).astype(jnp.float32)      # (T, C_out, C_in)
    b_col = jnp.asarray(bias, jnp.float32).reshape(C_out, 1)
    T = w_taps.shape[0]

    # Best-effort generation sniff: v7x has 2 TensorCores/chip, v5e/v6e have 1.
    try:
        kind = jax.devices()[0].device_kind.lower()
    except Exception:
        kind = ""
    multi_tc = ("v7" in kind) or ("7x" in kind)

    @jax.jit
    def forward(x):
        B, c_in, H, W = x.shape
        assert c_in == C_in
        M = H * W
        x_flat = x.reshape(B, C_in, M)                            # free reshape

        # Single invocation on 1-TC parts; grid=(B,) "parallel" on v7x (2 TCs).
        batch_block = 1 if (multi_tc and B > 1) else B
        grid = (B // batch_block,)
        sem = "parallel" if batch_block == 1 else "arbitrary"

        kernel = functools.partial(
            _decoder_subpixel_kernel, phase_specs=phase_specs,
            spatial=(H, W), act=act, batch_block=batch_block)

        out4 = pl.pallas_call(
            kernel,
            out_shape=jax.ShapeDtypeStruct((B, 4, C_out, M), x.dtype),
            grid_spec=pltpu.PrefetchScalarGridSpec(
                num_scalar_prefetch=0,
                grid=grid,
                in_specs=[
                    pl.BlockSpec((T, C_out, C_in), lambda b: (0, 0, 0)),   # resident
                    pl.BlockSpec((C_out, 1), lambda b: (0, 0)),            # resident
                    pl.BlockSpec((batch_block, C_in, M), lambda b: (b, 0, 0)),
                ],
                out_specs=pl.BlockSpec((batch_block, 4, C_out, M),
                                       lambda b: (b, 0, 0, 0)),
            ),
            compiler_params=pltpu.CompilerParams(
                dimension_semantics=(sem,)),
        )(w_taps, b_col, x_flat)

        # Phase interleave -> NCHW; tiny (64 KiB) op inside the same jit.
        out = out4.reshape(B, 2, 2, C_out, H, W)
        out = out.transpose(0, 3, 4, 1, 5, 2).reshape(B, C_out, 2 * H, 2 * W)
        return out

    return forward


if __name__ == "__main__":
    # Module config: Decoder_block(in_channel=4, out_channel=8, kernel=3,
    #                              stride=2, padding=1, out_padding=1, act='relu')
    B, C_in, C_out, H, W = 2, 4, 8, 16, 16
    k, stride, padding, out_padding = 3, 2, 1, 1

    key = jax.random.PRNGKey(0)
    kx, kw, kb = jax.random.split(key, 3)
    x = jax.random.normal(kx, (B, C_in, H, W), dtype=jnp.float32)
    # PyTorch ConvTranspose2d weight shape: (C_in, C_out, k, k)
    weight = jax.random.normal(kw, (C_in, C_out, k, k), dtype=jnp.float32) * 0.1
    bias = jax.random.normal(kb, (C_out,), dtype=jnp.float32) * 0.1

    fwd = make_decoder_block(weight, bias, stride=stride, padding=padding,
                             output_padding=out_padding, act="relu")
    out = fwd(x)
    jax.block_until_ready(out)
    assert out.shape == (B, C_out, 2 * H, 2 * W), out.shape

    # pure-JAX reference (dilated-conv formulation of ConvTranspose2d)
    pad_lo = k - 1 - padding
    pad_hi = k - 1 - padding + out_padding
    w_conv = jnp.transpose(jnp.flip(weight, axis=(2, 3)), (1, 0, 2, 3))  # (C_out,C_in,k,k)
    ref = lax.conv_general_dilated(
        x, w_conv, window_strides=(1, 1),
        padding=((pad_lo, pad_hi), (pad_lo, pad_hi)),
        lhs_dilation=(stride, stride),
        dimension_numbers=("NCHW", "OIHW", "NCHW"))
    ref = jnp.maximum(ref + bias[None, :, None, None], 0.0)
    assert bool(jnp.allclose(out, ref, atol=1e-3, rtol=1e-3)), "mismatch vs reference"

    print("KERNEL_OK")
</pallas_src>

<mosaic_0001>
module attributes {stable_mosaic.version = 11 : i64} {
  func.func @_decoder_subpixel_kernel(%arg0: i32, %arg1: memref<9x8x4xf32, #tpu.memory_space<vmem>>, %arg2: memref<8x1xf32, #tpu.memory_space<vmem>>, %arg3: memref<2x4x256xf32, #tpu.memory_space<vmem>>, %arg4: memref<2x4x8x256xf32, #tpu.memory_space<vmem>>) attributes {dimension_semantics = [#tpu.dimension_semantics<arbitrary>], iteration_bounds = array<i64: 1>, scalar_prefetch = 0 : i64, scratch_operands = 0 : i64, tpu.core_type = #tpu.core_type<tc>, window_params = [{pipeline_mode = #tpu.pipeline_mode<synchronous>, transform_indices = @transform_0, window_bounds = array<i64: 9, 8, 4>}, {pipeline_mode = #tpu.pipeline_mode<synchronous>, transform_indices = @transform_1, window_bounds = array<i64: 8, 1>}, {transform_indices = @transform_2, window_bounds = array<i64: 2, 4, 256>}, {transform_indices = @transform_3, window_bounds = array<i64: 2, 4, 8, 256>}]} {
    %0 = tpu.iota {dimensions = array<i32: 1>} : vector<4x256xi32>
    %c16_i32 = arith.constant 16 : i32
    %c0_i32 = arith.constant 0 : i32
    %1 = arith.cmpi eq, %c16_i32, %c0_i32 : i32
    %c1_i32 = arith.constant 1 : i32
    %2 = arith.select %1, %c1_i32, %c16_i32 : i32
    %3 = vector.broadcast %2 : i32 to vector<4x256xi32>
    %4 = arith.remsi %0, %3 : vector<4x256xi32>
    %c0_i32_0 = arith.constant 0 : i32
    %5 = vector.broadcast %c0_i32_0 : i32 to vector<4x256xi32>
    %6 = arith.cmpi ne, %4, %5 : vector<4x256xi32>
    %c0_i32_1 = arith.constant 0 : i32
    %7 = vector.broadcast %c0_i32_1 : i32 to vector<4x256xi32>
    %8 = arith.cmpi slt, %4, %7 : vector<4x256xi32>
    %c0_i32_2 = arith.constant 0 : i32
    %9 = arith.cmpi slt, %2, %c0_i32_2 : i32
    %10 = vector.broadcast %9 : i1 to vector<4x256xi1>
    %11 = vector.broadcast %10 : vector<4x256xi1> to vector<4x256xi1>
    %12 = arith.xori %8, %11 : vector<4x256xi1>
    %13 = arith.andi %12, %6 : vector<4x256xi1>
    %14 = vector.broadcast %2 : i32 to vector<4x256xi32>
    %15 = arith.addi %4, %14 : vector<4x256xi32>
    %16 = arith.select %13, %15, %4 : vector<4x256xi1>, vector<4x256xi32>
    %c0 = arith.constant 0 : index
    %c0_3 = arith.constant 0 : index
    %17 = vector.load %arg2[%c0, %c0_3] : memref<8x1xf32, #tpu.memory_space<vmem>>, vector<8x1xf32>
    %c0_4 = arith.constant 0 : index
    %c0_5 = arith.constant 0 : index
    %c0_6 = arith.constant 0 : index
    %18 = vector.load %arg3[%c0_4, %c0_5, %c0_6] : memref<2x4x256xf32, #tpu.memory_space<vmem>>, vector<1x4x256xf32>
    %19 = vector.shape_cast %18 : vector<1x4x256xf32> to vector<4x256xf32>
    %20 = vector.extract_strided_slice %19 {offsets = [0, 1], sizes = [4, 255], strides = [1, 1]} : vector<4x256xf32> to vector<4x255xf32>
    %cst = arith.constant 0.000000e+00 : f32
    %21 = vector.broadcast %cst : f32 to vector<4x1xf32>
    %22 = tpu.concatenate %20, %21 in 1 : vector<4x255xf32>, vector<4x1xf32> -> vector<4x256xf32>
    %c15_i32 = arith.constant 15 : i32
    %23 = vector.broadcast %c15_i32 : i32 to vector<4x256xi32>
    %24 = arith.cmpi slt, %16, %23 : vector<4x256xi32>
    %cst_7 = arith.constant 0.000000e+00 : f32
    %25 = vector.broadcast %cst_7 : f32 to vector<4x256xf32>
    %26 = arith.select %24, %22, %25 : vector<4x256xi1>, vector<4x256xf32>
    %27 = vector.extract_strided_slice %19 {offsets = [0, 16], sizes = [4, 240], strides = [1, 1]} : vector<4x256xf32> to vector<4x240xf32>
    %cst_8 = arith.constant 0.000000e+00 : f32
    %28 = vector.broadcast %cst_8 : f32 to vector<4x16xf32>
    %29 = tpu.concatenate %27, %28 in 1 : vector<4x240xf32>, vector<4x16xf32> -> vector<4x256xf32>
    %30 = vector.extract_strided_slice %19 {offsets = [0, 17], sizes = [4, 239], strides = [1, 1]} : vector<4x256xf32> to vector<4x239xf32>
    %cst_9 = arith.constant 0.000000e+00 : f32
    %31 = vector.broadcast %cst_9 : f32 to vector<4x17xf32>
    %32 = tpu.concatenate %30, %31 in 1 : vector<4x239xf32>, vector<4x17xf32> -> vector<4x256xf32>
    %c15_i32_10 = arith.constant 15 : i32
    %33 = vector.broadcast %c15_i32_10 : i32 to vector<4x256xi32>
    %34 = arith.cmpi slt, %16, %33 : vector<4x256xi32>
    %cst_11 = arith.constant 0.000000e+00 : f32
    %35 = vector.broadcast %cst_11 : f32 to vector<4x256xf32>
    %36 = arith.select %34, %32, %35 : vector<4x256xi1>, vector<4x256xf32>
    %cst_12 = arith.constant 0.000000e+00 : f32
    %37 = vector.broadcast %cst_12 : f32 to vector<8x256xf32>
    %c0_13 = arith.constant 0 : index
    %c0_14 = arith.constant 0 : index
    %c0_15 = arith.constant 0 : index
    %38 = vector.load %arg1[%c0_13, %c0_14, %c0_15] : memref<9x8x4xf32, #tpu.memory_space<vmem>>, vector<1x8x4xf32>
    %39 = vector.shape_cast %38 : vector<1x8x4xf32> to vector<8x4xf32>
    %cst_16 = arith.constant dense<0.000000e+00> : vector<8x256xf32>
    %40 = tpu.matmul %39, %19, %cst_16 {dimension_numbers = #tpu.dot_dimension_numbers<[1], [0], [0], [1], [0, 0, 1, 1], [], []>} : vector<8x4xf32>, vector<4x256xf32>, vector<8x256xf32> -> vector<8x256xf32>
    %41 = arith.addf %37, %40 : vector<8x256xf32>
    %42 = vector.broadcast %17 : vector<8x1xf32> to vector<8x256xf32>
    %43 = arith.addf %41, %42 : vector<8x256xf32>
    %cst_17 = arith.constant 0.000000e+00 : f32
    %44 = vector.broadcast %cst_17 : f32 to vector<8x256xf32>
    %45 = arith.maximumf %43, %44 : vector<8x256xf32>
    %c0_18 = arith.constant 0 : index
    %c0_19 = arith.constant 0 : index
    %c0_20 = arith.constant 0 : index
    %c0_21 = arith.constant 0 : index
    %46 = vector.load %arg4[%c0_18, %c0_19, %c0_20, %c0_21] : memref<2x4x8x256xf32, #tpu.memory_space<vmem>>, vector<1x1x8x256xf32>
    %47 = vector.shape_cast %46 : vector<1x1x8x256xf32> to vector<8x256xf32>
    %48 = vector.shape_cast %45 : vector<8x256xf32> to vector<1x1x8x256xf32>
    tpu.vector_store %arg4[%c0_18, %c0_19, %c0_20, %c0_21], %48 {strides = array<i32>} : memref<2x4x8x256xf32, #tpu.memory_space<vmem>>, vector<1x1x8x256xf32>,
    %cst_22 = arith.constant 0.000000e+00 : f32
    %49 = vector.broadcast %cst_22 : f32 to vector<8x256xf32>
    %c1 = arith.constant 1 : index
    %c0_23 = arith.constant 0 : index
    %c0_24 = arith.constant 0 : index
    %50 = vector.load %arg1[%c1, %c0_23, %c0_24] : memref<9x8x4xf32, #tpu.memory_space<vmem>>, vector<1x8x4xf32>
    %51 = vector.shape_cast %50 : vector<1x8x4xf32> to vector<8x4xf32>
    %cst_25 = arith.constant dense<0.000000e+00> : vector<8x256xf32>
    %52 = tpu.matmul %51, %26, %cst_25 {dimension_numbers = #tpu.dot_dimension_numbers<[1], [0], [0], [1], [0, 0, 1, 1], [], []>} : vector<8x4xf32>, vector<4x256xf32>, vector<8x256xf32> -> vector<8x256xf32>
    %53 = arith.addf %49, %52 : vector<8x256xf32>
    %c2 = arith.constant 2 : index
    %c0_26 = arith.constant 0 : index
    %c0_27 = arith.constant 0 : index
    %54 = vector.load %arg1[%c2, %c0_26, %c0_27] : memref<9x8x4xf32, #tpu.memory_space<vmem>>, vector<1x8x4xf32>
    %55 = vector.shape_cast %54 : vector<1x8x4xf32> to vector<8x4xf32>
    %cst_28 = arith.constant dense<0.000000e+00> : vector<8x256xf32>
    %56 = tpu.matmul %55, %19, %cst_28 {dimension_numbers = #tpu.dot_dimension_numbers<[1], [0], [0], [1], [0, 0, 1, 1], [], []>} : vector<8x4xf32>, vector<4x256xf32>, vector<8x256xf32> -> vector<8x256xf32>
    %57 = arith.addf %53, %56 : vector<8x256xf32>
    %58 = vector.broadcast %17 : vector<8x1xf32> to vector<8x256xf32>
    %59 = arith.addf %57, %58 : vector<8x256xf32>
    %cst_29 = arith.constant 0.000000e+00 : f32
    %60 = vector.broadcast %cst_29 : f32 to vector<8x256xf32>
    %61 = arith.maximumf %59, %60 : vector<8x256xf32>
    %c0_30 = arith.constant 0 : index
    %c1_31 = arith.constant 1 : index
    %c0_32 = arith.constant 0 : index
    %c0_33 = arith.constant 0 : index
    %62 = vector.load %arg4[%c0_30, %c1_31, %c0_32, %c0_33] : memref<2x4x8x256xf32, #tpu.memory_space<vmem>>, vector<1x1x8x256xf32>
    %63 = vector.shape_cast %62 : vector<1x1x8x256xf32> to vector<8x256xf32>
    %64 = vector.shape_cast %61 : vector<8x256xf32> to vector<1x1x8x256xf32>
    tpu.vector_store %arg4[%c0_30, %c1_31, %c0_32, %c0_33], %64 {strides = array<i32>} : memref<2x4x8x256xf32, #tpu.memory_space<vmem>>, vector<1x1x8x256xf32>,
    %cst_34 = arith.constant 0.000000e+00 : f32
    %65 = vector.broadcast %cst_34 : f32 to vector<8x256xf32>
    %c3 = arith.constant 3 : index
    %c0_35 = arith.constant 0 : index
    %c0_36 = arith.constant 0 : index
    %66 = vector.load %arg1[%c3, %c0_35, %c0_36] : memref<9x8x4xf32, #tpu.memory_space<vmem>>, vector<1x8x4xf32>
    %67 = vector.shape_cast %66 : vector<1x8x4xf32> to vector<8x4xf32>
    %cst_37 = arith.constant dense<0.000000e+00> : vector<8x256xf32>
    %68 = tpu.matmul %67, %29, %cst_37 {dimension_numbers = #tpu.dot_dimension_numbers<[1], [0], [0], [1], [0, 0, 1, 1], [], []>} : vector<8x4xf32>, vector<4x256xf32>, vector<8x256xf32> -> vector<8x256xf32>
    %69 = arith.addf %65, %68 : vector<8x256xf32>
    %c4 = arith.constant 4 : index
    %c0_38 = arith.constant 0 : index
    %c0_39 = arith.constant 0 : index
    %70 = vector.load %arg1[%c4, %c0_38, %c0_39] : memref<9x8x4xf32, #tpu.memory_space<vmem>>, vector<1x8x4xf32>
    %71 = vector.shape_cast %70 : vector<1x8x4xf32> to vector<8x4xf32>
    %cst_40 = arith.constant dense<0.000000e+00> : vector<8x256xf32>
    %72 = tpu.matmul %71, %19, %cst_40 {dimension_numbers = #tpu.dot_dimension_numbers<[1], [0], [0], [1], [0, 0, 1, 1], [], []>} : vector<8x4xf32>, vector<4x256xf32>, vector<8x256xf32> -> vector<8x256xf32>
    %73 = arith.addf %69, %72 : vector<8x256xf32>
    %74 = vector.broadcast %17 : vector<8x1xf32> to vector<8x256xf32>
    %75 = arith.addf %73, %74 : vector<8x256xf32>
    %cst_41 = arith.constant 0.000000e+00 : f32
    %76 = vector.broadcast %cst_41 : f32 to vector<8x256xf32>
    %77 = arith.maximumf %75, %76 : vector<8x256xf32>
    %c0_42 = arith.constant 0 : index
    %c2_43 = arith.constant 2 : index
    %c0_44 = arith.constant 0 : index
    %c0_45 = arith.constant 0 : index
    %78 = vector.load %arg4[%c0_42, %c2_43, %c0_44, %c0_45] : memref<2x4x8x256xf32, #tpu.memory_space<vmem>>, vector<1x1x8x256xf32>
    %79 = vector.shape_cast %78 : vector<1x1x8x256xf32> to vector<8x256xf32>
    %80 = vector.shape_cast %77 : vector<8x256xf32> to vector<1x1x8x256xf32>
    tpu.vector_store %arg4[%c0_42, %c2_43, %c0_44, %c0_45], %80 {strides = array<i32>} : memref<2x4x8x256xf32, #tpu.memory_space<vmem>>, vector<1x1x8x256xf32>,
    %cst_46 = arith.constant 0.000000e+00 : f32
    %81 = vector.broadcast %cst_46 : f32 to vector<8x256xf32>
    %c5 = arith.constant 5 : index
    %c0_47 = arith.constant 0 : index
    %c0_48 = arith.constant 0 : index
    %82 = vector.load %arg1[%c5, %c0_47, %c0_48] : memref<9x8x4xf32, #tpu.memory_space<vmem>>, vector<1x8x4xf32>
    %83 = vector.shape_cast %82 : vector<1x8x4xf32> to vector<8x4xf32>
    %cst_49 = arith.constant dense<0.000000e+00> : vector<8x256xf32>
    %84 = tpu.matmul %83, %36, %cst_49 {dimension_numbers = #tpu.dot_dimension_numbers<[1], [0], [0], [1], [0, 0, 1, 1], [], []>} : vector<8x4xf32>, vector<4x256xf32>, vector<8x256xf32> -> vector<8x256xf32>
    %85 = arith.addf %81, %84 : vector<8x256xf32>
    %c6 = arith.constant 6 : index
    %c0_50 = arith.constant 0 : index
    %c0_51 = arith.constant 0 : index
    %86 = vector.load %arg1[%c6, %c0_50, %c0_51] : memref<9x8x4xf32, #tpu.memory_space<vmem>>, vector<1x8x4xf32>
    %87 = vector.shape_cast %86 : vector<1x8x4xf32> to vector<8x4xf32>
    %cst_52 = arith.constant dense<0.000000e+00> : vector<8x256xf32>
    %88 = tpu.matmul %87, %29, %cst_52 {dimension_numbers = #tpu.dot_dimension_numbers<[1], [0], [0], [1], [0, 0, 1, 1], [], []>} : vector<8x4xf32>, vector<4x256xf32>, vector<8x256xf32> -> vector<8x256xf32>
    %89 = arith.addf %85, %88 : vector<8x256xf32>
    %c7 = arith.constant 7 : index
    %c0_53 = arith.constant 0 : index
    %c0_54 = arith.constant 0 : index
    %90 = vector.load %arg1[%c7, %c0_53, %c0_54] : memref<9x8x4xf32, #tpu.memory_space<vmem>>, vector<1x8x4xf32>
    %91 = vector.shape_cast %90 : vector<1x8x4xf32> to vector<8x4xf32>
    %cst_55 = arith.constant dense<0.000000e+00> : vector<8x256xf32>
    %92 = tpu.matmul %91, %26, %cst_55 {dimension_numbers = #tpu.dot_dimension_numbers<[1], [0], [0], [1], [0, 0, 1, 1], [], []>} : vector<8x4xf32>, vector<4x256xf32>, vector<8x256xf32> -> vector<8x256xf32>
    %93 = arith.addf %89, %92 : vector<8x256xf32>
    %c8 = arith.constant 8 : index
    %c0_56 = arith.constant 0 : index
    %c0_57 = arith.constant 0 : index
    %94 = vector.load %arg1[%c8, %c0_56, %c0_57] : memref<9x8x4xf32, #tpu.memory_space<vmem>>, vector<1x8x4xf32>
    %95 = vector.shape_cast %94 : vector<1x8x4xf32> to vector<8x4xf32>
    %cst_58 = arith.constant dense<0.000000e+00> : vector<8x256xf32>
    %96 = tpu.matmul %95, %19, %cst_58 {dimension_numbers = #tpu.dot_dimension_numbers<[1], [0], [0], [1], [0, 0, 1, 1], [], []>} : vector<8x4xf32>, vector<4x256xf32>, vector<8x256xf32> -> vector<8x256xf32>
    %97 = arith.addf %93, %96 : vector<8x256xf32>
    %98 = vector.broadcast %17 : vector<8x1xf32> to vector<8x256xf32>
    %99 = arith.addf %97, %98 : vector<8x256xf32>
    %cst_59 = arith.constant 0.000000e+00 : f32
    %100 = vector.broadcast %cst_59 : f32 to vector<8x256xf32>
    %101 = arith.maximumf %99, %100 : vector<8x256xf32>
    %c0_60 = arith.constant 0 : index
    %c3_61 = arith.constant 3 : index
    %c0_62 = arith.constant 0 : index
    %c0_63 = arith.constant 0 : index
    %102 = vector.load %arg4[%c0_60, %c3_61, %c0_62, %c0_63] : memref<2x4x8x256xf32, #tpu.memory_space<vmem>>, vector<1x1x8x256xf32>
    %103 = vector.shape_cast %102 : vector<1x1x8x256xf32> to vector<8x256xf32>
    %104 = vector.shape_cast %101 : vector<8x256xf32> to vector<1x1x8x256xf32>
    tpu.vector_store %arg4[%c0_60, %c3_61, %c0_62, %c0_63], %104 {strides = array<i32>} : memref<2x4x8x256xf32, #tpu.memory_space<vmem>>, vector<1x1x8x256xf32>,
    %c1_64 = arith.constant 1 : index
    %c0_65 = arith.constant 0 : index
    %c0_66 = arith.constant 0 : index
    %105 = vector.load %arg3[%c1_64, %c0_65, %c0_66] : memref<2x4x256xf32, #tpu.memory_space<vmem>>, vector<1x4x256xf32>
    %106 = vector.shape_cast %105 : vector<1x4x256xf32> to vector<4x256xf32>
    %107 = vector.extract_strided_slice %106 {offsets = [0, 1], sizes = [4, 255], strides = [1, 1]} : vector<4x256xf32> to vector<4x255xf32>
    %cst_67 = arith.constant 0.000000e+00 : f32
    %108 = vector.broadcast %cst_67 : f32 to vector<4x1xf32>
    %109 = tpu.concatenate %107, %108 in 1 : vector<4x255xf32>, vector<4x1xf32> -> vector<4x256xf32>
    %c15_i32_68 = arith.constant 15 : i32
    %110 = vector.broadcast %c15_i32_68 : i32 to vector<4x256xi32>
    %111 = arith.cmpi slt, %16, %110 : vector<4x256xi32>
    %cst_69 = arith.constant 0.000000e+00 : f32
    %112 = vector.broadcast %cst_69 : f32 to vector<4x256xf32>
    %113 = arith.select %111, %109, %112 : vector<4x256xi1>, vector<4x256xf32>
    %114 = vector.extract_strided_slice %106 {offsets = [0, 16], sizes = [4, 240], strides = [1, 1]} : vector<4x256xf32> to vector<4x240xf32>
    %cst_70 = arith.constant 0.000000e+00 : f32
    %115 = vector.broadcast %cst_70 : f32 to vector<4x16xf32>
    %116 = tpu.concatenate %114, %115 in 1 : vector<4x240xf32>, vector<4x16xf32> -> vector<4x256xf32>
    %117 = vector.extract_strided_slice %106 {offsets = [0, 17], sizes = [4, 239], strides = [1, 1]} : vector<4x256xf32> to vector<4x239xf32>
    %cst_71 = arith.constant 0.000000e+00 : f32
    %118 = vector.broadcast %cst_71 : f32 to vector<4x17xf32>
    %119 = tpu.concatenate %117, %118 in 1 : vector<4x239xf32>, vector<4x17xf32> -> vector<4x256xf32>
    %c15_i32_72 = arith.constant 15 : i32
    %120 = vector.broadcast %c15_i32_72 : i32 to vector<4x256xi32>
    %121 = arith.cmpi slt, %16, %120 : vector<4x256xi32>
    %cst_73 = arith.constant 0.000000e+00 : f32
    %122 = vector.broadcast %cst_73 : f32 to vector<4x256xf32>
    %123 = arith.select %121, %119, %122 : vector<4x256xi1>, vector<4x256xf32>
    %cst_74 = arith.constant 0.000000e+00 : f32
    %124 = vector.broadcast %cst_74 : f32 to vector<8x256xf32>
    %c0_75 = arith.constant 0 : index
    %c0_76 = arith.constant 0 : index
    %c0_77 = arith.constant 0 : index
    %125 = vector.load %arg1[%c0_75, %c0_76, %c0_77] : memref<9x8x4xf32, #tpu.memory_space<vmem>>, vector<1x8x4xf32>
    %126 = vector.shape_cast %125 : vector<1x8x4xf32> to vector<8x4xf32>
    %cst_78 = arith.constant dense<0.000000e+00> : vector<8x256xf32>
    %127 = tpu.matmul %126, %106, %cst_78 {dimension_numbers = #tpu.dot_dimension_numbers<[1], [0], [0], [1], [0, 0, 1, 1], [], []>} : vector<8x4xf32>, vector<4x256xf32>, vector<8x256xf32> -> vector<8x256xf32>
    %128 = arith.addf %124, %127 : vector<8x256xf32>
    %129 = vector.broadcast %17 : vector<8x1xf32> to vector<8x256xf32>
    %130 = arith.addf %128, %129 : vector<8x256xf32>
    %cst_79 = arith.constant 0.000000e+00 : f32
    %131 = vector.broadcast %cst_79 : f32 to vector<8x256xf32>
    %132 = arith.maximumf %130, %131 : vector<8x256xf32>
    %c1_80 = arith.constant 1 : index
    %c0_81 = arith.constant 0 : index
    %c0_82 = arith.constant 0 : index
    %c0_83 = arith.constant 0 : index
    %133 = vector.load %arg4[%c1_80, %c0_81, %c0_82, %c0_83] : memref<2x4x8x256xf32, #tpu.memory_space<vmem>>, vector<1x1x8x256xf32>
    %134 = vector.shape_cast %133 : vector<1x1x8x256xf32> to vector<8x256xf32>
    %135 = vector.shape_cast %132 : vector<8x256xf32> to vector<1x1x8x256xf32>
    tpu.vector_store %arg4[%c1_80, %c0_81, %c0_82, %c0_83], %135 {strides = array<i32>} : memref<2x4x8x256xf32, #tpu.memory_space<vmem>>, vector<1x1x8x256xf32>,
    %cst_84 = arith.constant 0.000000e+00 : f32
    %136 = vector.broadcast %cst_84 : f32 to vector<8x256xf32>
    %c1_85 = arith.constant 1 : index
    %c0_86 = arith.constant 0 : index
    %c0_87 = arith.constant 0 : index
    %137 = vector.load %arg1[%c1_85, %c0_86, %c0_87] : memref<9x8x4xf32, #tpu.memory_space<vmem>>, vector<1x8x4xf32>
    %138 = vector.shape_cast %137 : vector<1x8x4xf32> to vector<8x4xf32>
    %cst_88 = arith.constant dense<0.000000e+00> : vector<8x256xf32>
    %139 = tpu.matmul %138, %113, %cst_88 {dimension_numbers = #tpu.dot_dimension_numbers<[1], [0], [0], [1], [0, 0, 1, 1], [], []>} : vector<8x4xf32>, vector<4x256xf32>, vector<8x256xf32> -> vector<8x256xf32>
    %140 = arith.addf %136, %139 : vector<8x256xf32>
    %c2_89 = arith.constant 2 : index
    %c0_90 = arith.constant 0 : index
    %c0_91 = arith.constant 0 : index
    %141 = vector.load %arg1[%c2_89, %c0_90, %c0_91] : memref<9x8x4xf32, #tpu.memory_space<vmem>>, vector<1x8x4xf32>
    %142 = vector.shape_cast %141 : vector<1x8x4xf32> to vector<8x4xf32>
    %cst_92 = arith.constant dense<0.000000e+00> : vector<8x256xf32>
    %143 = tpu.matmul %142, %106, %cst_92 {dimension_numbers = #tpu.dot_dimension_numbers<[1], [0], [0], [1], [0, 0, 1, 1], [], []>} : vector<8x4xf32>, vector<4x256xf32>, vector<8x256xf32> -> vector<8x256xf32>
    %144 = arith.addf %140, %143 : vector<8x256xf32>
    %145 = vector.broadcast %17 : vector<8x1xf32> to vector<8x256xf32>
    %146 = arith.addf %144, %145 : vector<8x256xf32>
    %cst_93 = arith.constant 0.000000e+00 : f32
    %147 = vector.broadcast %cst_93 : f32 to vector<8x256xf32>
    %148 = arith.maximumf %146, %147 : vector<8x256xf32>
    %c1_94 = arith.constant 1 : index
    %c1_95 = arith.constant 1 : index
    %c0_96 = arith.constant 0 : index
    %c0_97 = arith.constant 0 : index
    %149 = vector.load %arg4[%c1_94, %c1_95, %c0_96, %c0_97] : memref<2x4x8x256xf32, #tpu.memory_space<vmem>>, vector<1x1x8x256xf32>
    %150 = vector.shape_cast %149 : vector<1x1x8x256xf32> to vector<8x256xf32>
    %151 = vector.shape_cast %148 : vector<8x256xf32> to vector<1x1x8x256xf32>
    tpu.vector_store %arg4[%c1_94, %c1_95, %c0_96, %c0_97], %151 {strides = array<i32>} : memref<2x4x8x256xf32, #tpu.memory_space<vmem>>, vector<1x1x8x256xf32>,
    %cst_98 = arith.constant 0.000000e+00 : f32
    %152 = vector.broadcast %cst_98 : f32 to vector<8x256xf32>
    %c3_99 = arith.constant 3 : index
    %c0_100 = arith.constant 0 : index
    %c0_101 = arith.constant 0 : index
    %153 = vector.load %arg1[%c3_99, %c0_100, %c0_101] : memref<9x8x4xf32, #tpu.memory_space<vmem>>, vector<1x8x4xf32>
    %154 = vector.shape_cast %153 : vector<1x8x4xf32> to vector<8x4xf32>
    %cst_102 = arith.constant dense<0.000000e+00> : vector<8x256xf32>
    %155 = tpu.matmul %154, %116, %cst_102 {dimension_numbers = #tpu.dot_dimension_numbers<[1], [0], [0], [1], [0, 0, 1, 1], [], []>} : vector<8x4xf32>, vector<4x256xf32>, vector<8x256xf32> -> vector<8x256xf32>
    %156 = arith.addf %152, %155 : vector<8x256xf32>
    %c4_103 = arith.constant 4 : index
    %c0_104 = arith.constant 0 : index
    %c0_105 = arith.constant 0 : index
    %157 = vector.load %arg1[%c4_103, %c0_104, %c0_105] : memref<9x8x4xf32, #tpu.memory_space<vmem>>, vector<1x8x4xf32>
    %158 = vector.shape_cast %157 : vector<1x8x4xf32> to vector<8x4xf32>
    %cst_106 = arith.constant dense<0.000000e+00> : vector<8x256xf32>
    %159 = tpu.matmul %158, %106, %cst_106 {dimension_numbers = #tpu.dot_dimension_numbers<[1], [0], [0], [1], [0, 0, 1, 1], [], []>} : vector<8x4xf32>, vector<4x256xf32>, vector<8x256xf32> -> vector<8x256xf32>
    %160 = arith.addf %156, %159 : vector<8x256xf32>
    %161 = vector.broadcast %17 : vector<8x1xf32> to vector<8x256xf32>
    %162 = arith.addf %160, %161 : vector<8x256xf32>
    %cst_107 = arith.constant 0.000000e+00 : f32
    %163 = vector.broadcast %cst_107 : f32 to vector<8x256xf32>
    %164 = arith.maximumf %162, %163 : vector<8x256xf32>
    %c1_108 = arith.constant 1 : index
    %c2_109 = arith.constant 2 : index
    %c0_110 = arith.constant 0 : index
    %c0_111 = arith.constant 0 : index
    %165 = vector.load %arg4[%c1_108, %c2_109, %c0_110, %c0_111] : memref<2x4x8x256xf32, #tpu.memory_space<vmem>>, vector<1x1x8x256xf32>
    %166 = vector.shape_cast %165 : vector<1x1x8x256xf32> to vector<8x256xf32>
    %167 = vector.shape_cast %164 : vector<8x256xf32> to vector<1x1x8x256xf32>
    tpu.vector_store %arg4[%c1_108, %c2_109, %c0_110, %c0_111], %167 {strides = array<i32>} : memref<2x4x8x256xf32, #tpu.memory_space<vmem>>, vector<1x1x8x256xf32>,
    %cst_112 = arith.constant 0.000000e+00 : f32
    %168 = vector.broadcast %cst_112 : f32 to vector<8x256xf32>
    %c5_113 = arith.constant 5 : index
    %c0_114 = arith.constant 0 : index
    %c0_115 = arith.constant 0 : index
    %169 = vector.load %arg1[%c5_113, %c0_114, %c0_115] : memref<9x8x4xf32, #tpu.memory_space<vmem>>, vector<1x8x4xf32>
    %170 = vector.shape_cast %169 : vector<1x8x4xf32> to vector<8x4xf32>
    %cst_116 = arith.constant dense<0.000000e+00> : vector<8x256xf32>
    %171 = tpu.matmul %170, %123, %cst_116 {dimension_numbers = #tpu.dot_dimension_numbers<[1], [0], [0], [1], [0, 0, 1, 1], [], []>} : vector<8x4xf32>, vector<4x256xf32>, vector<8x256xf32> -> vector<8x256xf32>
    %172 = arith.addf %168, %171 : vector<8x256xf32>
    %c6_117 = arith.constant 6 : index
    %c0_118 = arith.constant 0 : index
    %c0_119 = arith.constant 0 : index
    %173 = vector.load %arg1[%c6_117, %c0_118, %c0_119] : memref<9x8x4xf32, #tpu.memory_space<vmem>>, vector<1x8x4xf32>
    %174 = vector.shape_cast %173 : vector<1x8x4xf32> to vector<8x4xf32>
    %cst_120 = arith.constant dense<0.000000e+00> : vector<8x256xf32>
    %175 = tpu.matmul %174, %116, %cst_120 {dimension_numbers = #tpu.dot_dimension_numbers<[1], [0], [0], [1], [0, 0, 1, 1], [], []>} : vector<8x4xf32>, vector<4x256xf32>, vector<8x256xf32> -> vector<8x256xf32>
    %176 = arith.addf %172, %175 : vector<8x256xf32>
    %c7_121 = arith.constant 7 : index
    %c0_122 = arith.constant 0 : index
    %c0_123 = arith.constant 0 : index
    %177 = vector.load %arg1[%c7_121, %c0_122, %c0_123] : memref<9x8x4xf32, #tpu.memory_space<vmem>>, vector<1x8x4xf32>
    %178 = vector.shape_cast %177 : vector<1x8x4xf32> to vector<8x4xf32>
    %cst_124 = arith.constant dense<0.000000e+00> : vector<8x256xf32>
    %179 = tpu.matmul %178, %113, %cst_124 {dimension_numbers = #tpu.dot_dimension_numbers<[1], [0], [0], [1], [0, 0, 1, 1], [], []>} : vector<8x4xf32>, vector<4x256xf32>, vector<8x256xf32> -> vector<8x256xf32>
    %180 = arith.addf %176, %179 : vector<8x256xf32>
    %c8_125 = arith.constant 8 : index
    %c0_126 = arith.constant 0 : index
    %c0_127 = arith.constant 0 : index
    %181 = vector.load %arg1[%c8_125, %c0_126, %c0_127] : memref<9x8x4xf32, #tpu.memory_space<vmem>>, vector<1x8x4xf32>
    %182 = vector.shape_cast %181 : vector<1x8x4xf32> to vector<8x4xf32>
    %cst_128 = arith.constant dense<0.000000e+00> : vector<8x256xf32>
    %183 = tpu.matmul %182, %106, %cst_128 {dimension_numbers = #tpu.dot_dimension_numbers<[1], [0], [0], [1], [0, 0, 1, 1], [], []>} : vector<8x4xf32>, vector<4x256xf32>, vector<8x256xf32> -> vector<8x256xf32>
    %184 = arith.addf %180, %183 : vector<8x256xf32>
    %185 = vector.broadcast %17 : vector<8x1xf32> to vector<8x256xf32>
    %186 = arith.addf %184, %185 : vector<8x256xf32>
    %cst_129 = arith.constant 0.000000e+00 : f32
    %187 = vector.broadcast %cst_129 : f32 to vector<8x256xf32>
    %188 = arith.maximumf %186, %187 : vector<8x256xf32>
    %c1_130 = arith.constant 1 : index
    %c3_131 = arith.constant 3 : index
    %c0_132 = arith.constant 0 : index
    %c0_133 = arith.constant 0 : index
    %189 = vector.load %arg4[%c1_130, %c3_131, %c0_132, %c0_133] : memref<2x4x8x256xf32, #tpu.memory_space<vmem>>, vector<1x1x8x256xf32>
    %190 = vector.shape_cast %189 : vector<1x1x8x256xf32> to vector<8x256xf32>
    %191 = vector.shape_cast %188 : vector<8x256xf32> to vector<1x1x8x256xf32>
    tpu.vector_store %arg4[%c1_130, %c3_131, %c0_132, %c0_133], %191 {strides = array<i32>} : memref<2x4x8x256xf32, #tpu.memory_space<vmem>>, vector<1x1x8x256xf32>,
    return
  }
  func.func @transform_0(%arg0: i32) -> (i32, i32, i32) {
    %c0_i32 = arith.constant 0 : i32
    %c0_i32_0 = arith.constant 0 : i32
    %c0_i32_1 = arith.constant 0 : i32
    %c0_i32_2 = arith.constant 0 : i32
    return %c0_i32, %c0_i32_0, %c0_i32_1 : i32, i32, i32
  }
  func.func @transform_1(%arg0: i32) -> (i32, i32) {
    %c0_i32 = arith.constant 0 : i32
    %c0_i32_0 = arith.constant 0 : i32
    %c0_i32_1 = arith.constant 0 : i32
    return %c0_i32, %c0_i32_0 : i32, i32
  }
  func.func @transform_2(%arg0: i32) -> (i32, i32, i32) {
    %c0_i32 = arith.constant 0 : i32
    %c0_i32_0 = arith.constant 0 : i32
    %c0_i32_1 = arith.constant 0 : i32
    return %arg0, %c0_i32, %c0_i32_0 : i32, i32, i32
  }
  func.func @transform_3(%arg0: i32) -> (i32, i32, i32, i32) {
    %c0_i32 = arith.constant 0 : i32
    %c0_i32_0 = arith.constant 0 : i32
    %c0_i32_1 = arith.constant 0 : i32
    %c0_i32_2 = arith.constant 0 : i32
    return %arg0, %c0_i32, %c0_i32_0, %c0_i32_1 : i32, i32, i32, i32
  }
}

</mosaic_0001>

<bundles_post_ra>
// kernel: forward.1
= control target key start
LH: loop header
LB: loop body
LE: loop exit
PB: predicated region body
PF: predicated region fallthrough
CT: control target
= control target key end

     0   :  { %v1691_v1 = vmov 0.0   ;;  %vm87_vm0 = vcmask 1043456   ;;  %s1692_s14 = smov 112   ;;  %s1693_s15 = smov 127   ;;  %vm83_vm1 = vcmask 31744   ;;  %v1695_v8 = vmov 0   ;;  %s1982_s2 = inlined_call_operand.vmem [shape: f32[2,4,256], index: 2, kind: input, shape index: {}]   ;;  %s1983_s0 = inlined_call_operand.vmem [shape: f32[9,8,4], index: 0, kind: input, shape index: {}]   ;;  %s1984_s1 = inlined_call_operand.vmem [shape: f32[8,1], index: 1, kind: input, shape index: {}]   ;;  %s1985_s3 = inlined_call_operand.vmem [shape: f32[2,4,8,256], index: 3, kind: output, shape index: {}]  }
   0x1   :  { %v1719_v0 = vld [vmem:[%s1982_s2] sm:$0xff]  ;;  %156 = vmatprep.mubr.f32.mxu0 %v1691_v1  ;;  %318 = vmatprep.mubr.f32.mxu1 %v1691_v1  ;;  %v1747_v4 = vld [vmem:[%s1983_s0 + $0x10] sm:$0xff]  ;;  %v1752_v5 = vld [vmem:[%s1982_s2 + $0x8] sm:$0xff]  ;;  %s1694_s22 = smov 111   ;;  %v14_v10 = vlaneseq  ;;  %vm62_vm2 = vcmask 916480   ;;  %vm49_vm3 = vcmask 1039360  }
   0x2   :  { %v1725_v2 = vcombine.high %v1719_v0, %v1719_v0  ;;  %v1732_v3 = vld [vmem:[%s1983_s0] sm:$0xff]  ;;  %v1765_v6 = vcombine.high %v1752_v5, %v1752_v5  ;;  %1688 = vset.pattern.permute.xlu0 %v1695_v8  ;;  %v1804_v24 = vld [vmem:[%s1983_s0 + $0x18] sm:$0xff]  ;;  %v1581_v27 = vld [vmem:[%s1983_s0 + $0x8] sm:$0xff]  ;;  %vm70_vm6 = vcmask 908288  }
   0x3   :  { %v1770_v7 = vld [vmem:[%s1983_s0 + $0x20] sm:$0xff]  ;;  %v15_v11 = vand.u32 127, %v14_v10  ;;  %v1602_v33 = vld [vmem:[%s1983_s0 + $0x30] sm:$0xff]  ;;  %v1601_v40 = vld [vmem:[%s1983_s0 + $0x28] sm:$0xff] }
   0x4   :  { %60 = vrot.lane.b32.xlu1 %v1725_v2, %s1692_s14  ;;  %47 = vrot.lane.b32.xlu0 %v1725_v2, %s1693_s15  ;;  %v41_v9 = vld [vmem:[%s1984_s1] sm:$0xff]  ;;  %v1609_v48 = vld [vmem:[%s1983_s0 + $0x38] sm:$0xff] }
   0x5   :  { %1578 = vmatprep.subr.msk.mxu0 %vm87_vm0, %v1725_v2  ;;  %v16_v12 = vadd.s32 128, %v15_v11  ;;  %v21_v15 = vand.u32 15, %v15_v11  ;;  %v1613_v51 = vld [vmem:[%s1983_s0 + $0x40] sm:$0xff] }
   0x6   :  { %1579 = vmatpush1.msk.msra.mxu0 %vm87_vm0, %v1719_v0 }
   0x7   :  { %1580 = vmatmul.mubr.msk.f32.vlgmr.msra.gmra.mrb[0].mxu0 %vm83_vm1, %v1732_v3  ;;  %1583 = vmatprep.subr.msk.mxu0 %vm87_vm0, %v1725_v2  ;;  %v28_v13 = vand.u32 15, %v16_v12  ;;  %vm1797_vm5 = vcmp.lt.s32.totalorder %v21_v15, 15 }
   0x8   :  { %58 = vrot.lane.b32.xlu1 %v1719_v0, %s1692_s14  ;;  %45 = vrot.lane.b32.xlu0 %v1719_v0, %s1693_s15 }
   0x9   :  { %1584 = vmatpush1.msk.msra.mxu0 %vm87_vm0, %v1719_v0  ;;  %238 = vmatprep.mubr.f32.mxu0 %v1691_v1  ;;  %vm1787_vm4 = vcmp.lt.s32.totalorder %v28_v13, 15 }
   0xa   :  { %1593 = vmatprep.subr.msk.mxu0 %vm87_vm0, %v1725_v2 }
   0xb   :  { %1585 = vmatmul.mubr.msk.f32.vlgmr.msra.gmra.mrb[2].mxu0 %vm83_vm1, %v1747_v4 }
   0xc   :  { %68 = vrot.lane.b32.xlu0 %v1725_v2, %s1694_s22  ;;  %66 = vrot.lane.b32.xlu1 %v1719_v0, %s1694_s22 }
   0xd   :  { %1594 = vmatpush1.msk.msra.mxu0 %vm87_vm0, %v1719_v0  ;;  %403 = vmatprep.mubr.f32.mxu0 %v1691_v1 }
   0xf   :  { %1595 = vmatmul.mubr.msk.f32.vlgmr.msra.gmra.mrb[4].mxu0 %vm83_vm1, %v1770_v7 }
  0x10   :  { %833 = vrot.lane.b32.xlu0 %v1765_v6, %s1692_s14  ;;  %831 = vrot.lane.b32.xlu1 %v1752_v5, %s1692_s14 }
  0x11   :  { %482 = vmatprep.mubr.f32.mxu0 %v1691_v1 }
  0x14   :  { %840 = vrot.lane.b32.xlu0 %v1765_v6, %s1694_s22  ;;  %838 = vrot.lane.b32.xlu1 %v1752_v5, %s1694_s22 }
  0x18   :  { %823 = vrot.lane.b32.xlu0 %v1765_v6, %s1693_s15  ;;  %821 = vrot.lane.b32.xlu1 %v1752_v5, %s1693_s15 }
  0x1c   :  { %80 = vperm.xlu0 %1688, %v41_v9  }
  0x76   :  { %v61_v16 = vpop.permute.xlu1 %60  ;;  %v48_v17 = vpop.permute.xlu0 %47 }
  0x77   :  { %v65_v18 = vsel %vm62_vm2, %v61_v16, 0.0  ;;  %v53_v19 = vsel %vm49_vm3, %v48_v17, 0.0 }
  0x78   :  { %v57_v20 = vsel %vm1787_vm4, %v53_v19, 0.0  ;;  %1596 = vmatprep.subr.msk.mxu0 %vm87_vm0, %v65_v18 }
  0x79   :  { %1586 = vmatprep.subr.msk.mxu1 %vm87_vm0, %v57_v20 }
  0x7a   :  { %v59_v22 = vpop.permute.xlu1 %58  ;;  %v46_v23 = vpop.permute.xlu0 %45 }
  0x7b   :  { %v63_v25 = vsel %vm62_vm2, %v59_v22, %v61_v16  ;;  %v50_v26 = vsel %vm49_vm3, %v46_v23, %v48_v17 }
  0x7c   :  { %1597 = vmatpush1.msk.msra.mxu0 %vm87_vm0, %v63_v25  ;;  %v56_v28 = vsel %vm1797_vm5, %v50_v26, 0.0 }
  0x7d   :  { %1587 = vmatpush1.msk.msra.mxu1 %vm87_vm0, %v56_v28  ;;  %1598 = vmatmul.mubr.msk.f32.vlgmr.msra.gmra.mrb[4].mxu0 %vm83_vm1, %v1804_v24 }
  0x7e   :  { %1603 = vmatprep.subr.msk.mxu1 %vm87_vm0, %v65_v18  ;;  %v69_v29 = vpop.permute.xlu0 %68  ;;  %1588 = vmatmul.mubr.msk.f32.vlgmr.msra.gmra.mrb[0].mxu1 %vm83_vm1, %v1581_v27  ;;  %v67_v30 = vpop.permute.xlu1 %66 }
  0x7f   :  { %v74_v31 = vsel %vm70_vm6, %v69_v29, 0.0  ;;  %v71_v32 = vsel %vm70_vm6, %v67_v30, %v69_v29  ;;  %1604 = vmatpush1.msk.msra.mxu1 %vm87_vm0, %v63_v25  ;;  %567 = vmatprep.mubr.f32.mxu1 %v1691_v1 }
  0x80   :  { %v76_v34 = vsel %vm1787_vm4, %v74_v31, 0.0  ;;  %v75_v35 = vsel %vm1797_vm5, %v71_v32, 0.0  ;;  %1620 = vmatprep.subr.msk.mxu0 %vm87_vm0, %v1765_v6  ;;  %920 = vmatprep.mubr.f32.mxu0 %v1691_v1 }
  0x81   :  { %1606 = vmatprep.subr.msk.mxu1 %vm87_vm0, %v76_v34  ;;  %1621 = vmatpush1.msk.msra.mxu0 %vm87_vm0, %v1752_v5 }
  0x82   :  { %1605 = vmatmul.mubr.msk.f32.vlgmr.msra.gmra.mrb[2].mxu1 %vm83_vm1, %v1602_v33  ;;  %v834_v36 = vpop.permute.xlu0 %833  ;;  %v832_v37 = vpop.permute.xlu1 %831  ;;  %1622 = vmatmul.mubr.msk.f32.vlgmr.msra.gmra.mrb[6].mxu0 %vm83_vm1, %v1732_v3 }
  0x83   :  { %1607 = vmatpush1.msk.msra.mxu1 %vm87_vm0, %v75_v35  ;;  %647 = vmatprep.mubr.f32.mxu1 %v1691_v1  ;;  %v837_v47 = vsel %vm62_vm2, %v834_v36, 0.0  ;;  %v835_v49 = vsel %vm62_vm2, %v832_v37, %v834_v36 }
  0x84   :  { %1610 = vmatprep.subr.msk.mxu1 %vm87_vm0, %v57_v20  ;;  %1627 = vmatprep.subr.msk.mxu0 %vm87_vm0, %v1765_v6 }
  0x85   :  { %1628 = vmatpush1.msk.msra.mxu0 %vm87_vm0, %v1752_v5  ;;  %1001 = vmatprep.mubr.f32.mxu0 %v1691_v1 }
  0x86   :  { %v841_v38 = vpop.permute.xlu0 %840  ;;  %v839_v39 = vpop.permute.xlu1 %838  ;;  %1629 = vmatmul.mubr.msk.f32.vlgmr.msra.gmra.mrb[8].mxu0 %vm83_vm1, %v1747_v4 }
  0x87   :  { %1081 = vmatprep.mubr.f32.mxu0 %v1691_v1  ;;  %v845_v50 = vsel %vm70_vm6, %v841_v38, 0.0  ;;  %v842_v53 = vsel %vm70_vm6, %v839_v39, %v841_v38 }
  0x88   :  { %v847_v52 = vsel %vm1787_vm4, %v845_v50, 0.0  ;;  %v846_v54 = vsel %vm1797_vm5, %v842_v53, 0.0 }
  0x8a   :  { %1608 = vmatmul.mubr.msk.f32.vlgmr.msra.gmra.mrb[2].mxu1 %vm83_vm1, %v1601_v40  ;;  %v824_v41 = vpop.permute.xlu0 %823  ;;  %v822_v42 = vpop.permute.xlu1 %821 }
  0x8b   :  { %1611 = vmatpush1.msk.msra.mxu1 %vm87_vm0, %v56_v28  ;;  %v828_v43 = vsel %vm49_vm3, %v824_v41, 0.0  ;;  %v825_v44 = vsel %vm49_vm3, %v822_v42, %v824_v41  ;;  %723 = vmatprep.mubr.f32.mxu1 %v1691_v1 }
  0x8c   :  { %v830_v45 = vsel %vm1787_vm4, %v828_v43, 0.0  ;;  %v829_v46 = vsel %vm1797_vm5, %v825_v44, 0.0  ;;  %1614 = vmatprep.subr.msk.mxu1 %vm87_vm0, %v1725_v2 }
  0x8d   :  { %1630 = vmatprep.subr.msk.mxu0 %vm87_vm0, %v830_v45 }
  0x8e   :  { %1631 = vmatpush1.msk.msra.mxu0 %vm87_vm0, %v829_v46 }
  0x8f   :  { %1632 = vmatmul.mubr.msk.f32.vlgmr.msra.gmra.mrb[8].mxu0 %vm83_vm1, %v1581_v27  ;;  %1637 = vmatprep.subr.msk.mxu0 %vm87_vm0, %v1765_v6 }
  0x90   :  { %1638 = vmatpush1.msk.msra.mxu0 %vm87_vm0, %v1752_v5  ;;  %1164 = vmatprep.mubr.f32.mxu0 %v1691_v1 }
  0x91   :  { %1640 = vmatprep.subr.msk.mxu0 %vm87_vm0, %v837_v47 }
  0x92   :  { %1612 = vmatmul.mubr.msk.f32.vlgmr.msra.gmra.mrb[2].mxu1 %vm83_vm1, %v1609_v48 }
  0x93   :  { %1615 = vmatpush1.msk.msra.mxu1 %vm87_vm0, %v1719_v0  ;;  %801 = vmatprep.mubr.f32.mxu1 %v1691_v1 }
  0x94   :  { %1639 = vmatmul.mubr.msk.f32.vlgmr.msra.gmra.mrb[10].mxu0 %vm83_vm1, %v1770_v7  ;;  %1647 = vmatprep.subr.msk.mxu1 %vm87_vm0, %v837_v47 }
  0x95   :  { %1641 = vmatpush1.msk.msra.mxu0 %vm87_vm0, %v835_v49  ;;  %1243 = vmatprep.mubr.f32.mxu0 %v1691_v1 }
  0x9a   :  { %1616 = vmatmul.mubr.msk.f32.vlgmr.msra.gmra.mrb[2].mxu1 %vm83_vm1, %v1613_v51 }
  0x9b   :  { %1648 = vmatpush1.msk.msra.mxu1 %vm87_vm0, %v835_v49  ;;  %1326 = vmatprep.mubr.f32.mxu1 %v1691_v1  ;;  %v1916_v56 = vpop.permute.xlu0 %80 }
  0x9c   :  { %1650 = vmatprep.subr.msk.mxu1 %vm87_vm0, %v847_v52  ;;  %1642 = vmatmul.mubr.msk.f32.vlgmr.msra.gmra.mrb[10].mxu0 %vm83_vm1, %v1804_v24 }
  0x9e   :  { %1649 = vmatmul.mubr.msk.f32.vlgmr.msra.gmra.mrb[4].mxu1 %vm83_vm1, %v1602_v33 }
  0x9f   :  { %1651 = vmatpush1.msk.msra.mxu1 %vm87_vm0, %v846_v54  ;;  %1406 = vmatprep.mubr.f32.mxu1 %v1691_v1 }
  0xa0   :  { %1654 = vmatprep.subr.msk.mxu1 %vm87_vm0, %v830_v45 }
  0xa6   :  { %1652 = vmatmul.mubr.msk.f32.vlgmr.msra.gmra.mrb[4].mxu1 %vm83_vm1, %v1601_v40 }
  0xa7   :  { %1655 = vmatpush1.msk.msra.mxu1 %vm87_vm0, %v829_v46  ;;  %1481 = vmatprep.mubr.f32.mxu1 %v1691_v1 }
  0xa8   :  { %1658 = vmatprep.subr.msk.mxu1 %vm87_vm0, %v1765_v6 }
  0xae   :  { %1656 = vmatmul.mubr.msk.f32.vlgmr.msra.gmra.mrb[4].mxu1 %vm83_vm1, %v1609_v48 }
  0xaf   :  { %1659 = vmatpush1.msk.msra.mxu1 %vm87_vm0, %v1752_v5  ;;  %1558 = vmatprep.mubr.f32.mxu1 %v1691_v1 }
  0xb6   :  { %1660 = vmatmul.mubr.msk.f32.vlgmr.msra.gmra.mrb[4].mxu1 %vm83_vm1, %v1613_v51 }
  0xda   :  { %v158_v55 = vpop.f32.mrb[0].mxu0 }
  0xdb   :  { %v160_v57 = vpop.f32.mrb[1].mxu0  ;;  %v159_v58 = vadd.f32 %v158_v55, %v1916_v56 }
  0xdc   :  { %v161_v59 = vadd.f32 %v160_v57, %v1916_v56 }
  0xdd   :  { %v163_v60 = vmax.f32 %v159_v58, 0.0 }
  0xde   :  { %v240_v61 = vpop.f32.mrb[2].mxu0  ;;  %v164_v62 = vmax.f32 %v161_v59, 0.0 }
  0xdf   :  { %v242_v63 = vpop.f32.mrb[3].mxu0  ;;  %165 = vst [vmem:[%s1985_s3] sm:$0xff] %v163_v60 }
  0xe0   :  { %166 = vst [vmem:[%s1985_s3 + $0x8] sm:$0xff] %v164_v62 }
 0x150   :  { %v484_v0 = vpop.f32.mrb[4].mxu0 }
 0x151   :  { %v320_v1 = vpop.f32.mrb[0].mxu1  ;;  %v489_v2 = vadd.f32 %v484_v0, %v1916_v56  ;;  %v486_v3 = vpop.f32.mrb[5].mxu0 }
 0x152   :  { %v321_v4 = vadd.f32 %v320_v1, %v240_v61  ;;  %v322_v5 = vpop.f32.mrb[1].mxu1  ;;  %v490_v6 = vadd.f32 %v486_v3, %v1916_v56 }
 0x153   :  { %v323_v7 = vadd.f32 %v322_v5, %v242_v63  ;;  %v491_v8 = vmax.f32 %v489_v2, 0.0 }
 0x154   :  { %v325_v9 = vadd.f32 %v321_v4, %v1916_v56  ;;  %v492_v10 = vmax.f32 %v490_v6, 0.0 }
 0x155   :  { %v326_v11 = vadd.f32 %v323_v7, %v1916_v56  ;;  %1599 = vst [vmem:[%s1985_s3 + $0x20] sm:$0xff] %v491_v8  ;;  %v922_v12 = vpop.f32.mrb[6].mxu0 }
 0x156   :  { %v327_v13 = vmax.f32 %v325_v9, 0.0  ;;  %1600 = vst [vmem:[%s1985_s3 + $0x28] sm:$0xff] %v492_v10  ;;  %v923_v14 = vadd.f32 %v922_v12, %v1916_v56  ;;  %v924_v15 = vpop.f32.mrb[7].mxu0 }
 0x157   :  { %v328_v16 = vmax.f32 %v326_v11, 0.0  ;;  %v925_v17 = vadd.f32 %v924_v15, %v1916_v56 }
 0x158   :  { %1589 = vst [vmem:[%s1985_s3 + $0x10] sm:$0xff] %v327_v13  ;;  %v927_v18 = vmax.f32 %v923_v14, 0.0 }
 0x159   :  { %1590 = vst [vmem:[%s1985_s3 + $0x18] sm:$0xff] %v328_v16  ;;  %v928_v19 = vmax.f32 %v925_v17, 0.0 }
 0x15a   :  { %1623 = vst [vmem:[%s1985_s3 + $0x40] sm:$0xff] %v927_v18 }
 0x15b   :  { %1624 = vst [vmem:[%s1985_s3 + $0x48] sm:$0xff] %v928_v19 }
 0x162   :  { %v1083_v20 = vpop.f32.mrb[8].mxu0 }
 0x163   :  { %v1088_v21 = vadd.f32 %v1083_v20, %v1916_v56  ;;  %v1085_v22 = vpop.f32.mrb[9].mxu0 }
 0x164   :  { %v1089_v23 = vadd.f32 %v1085_v22, %v1916_v56 }
 0x165   :  { %v1090_v24 = vmax.f32 %v1088_v21, 0.0 }
 0x166   :  { %v1091_v25 = vmax.f32 %v1089_v23, 0.0 }
 0x167   :  { %1633 = vst [vmem:[%s1985_s3 + $0x50] sm:$0xff] %v1090_v24 }
 0x168   :  { %1634 = vst [vmem:[%s1985_s3 + $0x58] sm:$0xff] %v1091_v25 }
 0x16d   :  { %v803_v26 = vpop.f32.mrb[2].mxu1 }
 0x16e   :  { %v810_v27 = vadd.f32 %v803_v26, %v1916_v56  ;;  %v805_v28 = vpop.f32.mrb[3].mxu1 }
 0x16f   :  { %v811_v29 = vadd.f32 %v805_v28, %v1916_v56  ;;  %v1245_v30 = vpop.f32.mrb[10].mxu0 }
 0x170   :  { %v812_v31 = vmax.f32 %v810_v27, 0.0  ;;  %v1250_v32 = vadd.f32 %v1245_v30, %v1916_v56  ;;  %v1247_v33 = vpop.f32.mrb[11].mxu0 }
 0x171   :  { %v813_v34 = vmax.f32 %v811_v29, 0.0  ;;  %v1251_v35 = vadd.f32 %v1247_v33, %v1916_v56 }
 0x172   :  { %1617 = vst [vmem:[%s1985_s3 + $0x30] sm:$0xff] %v812_v31  ;;  %v1252_v36 = vmax.f32 %v1250_v32, 0.0 }
 0x173   :  { %1618 = vst [vmem:[%s1985_s3 + $0x38] sm:$0xff] %v813_v34  ;;  %v1253_v37 = vmax.f32 %v1251_v35, 0.0 }
 0x174   :  { %1643 = vst [vmem:[%s1985_s3 + $0x60] sm:$0xff] %v1252_v36 }
 0x175   :  { %1644 = vst [vmem:[%s1985_s3 + $0x68] sm:$0xff] %v1253_v37 }
 0x189   :  { %v1560_v38 = vpop.f32.mrb[4].mxu1 }
 0x18a   :  { %v1567_v39 = vadd.f32 %v1560_v38, %v1916_v56  ;;  %v1562_v40 = vpop.f32.mrb[5].mxu1 }
 0x18b   :  { %v1568_v41 = vadd.f32 %v1562_v40, %v1916_v56 }
 0x18c   :  { %v1569_v42 = vmax.f32 %v1567_v39, 0.0 }
 0x18d   :  { %v1570_v43 = vmax.f32 %v1568_v41, 0.0 }
 0x18e   :  { %1661 = vst [vmem:[%s1985_s3 + $0x70] sm:$0xff] %v1569_v42 }
 0x18f   :  { %1662 = vst [vmem:[%s1985_s3 + $0x78] sm:$0xff] %v1570_v43 }

</bundles_post_ra>
